<compile_context>
chip_gen: v6e
topology: v6e:2x2x1
jax: 0.10.0
libtpu: 0.0.40
codegen_flags: <defaults>
</compile_context>

<pallas_src>
import functools

import jax
import jax.numpy as jnp
from jax import lax
from jax.experimental import pallas as pl
from jax.experimental.pallas import tpu as pltpu

NEG_BIG = -1e30   # plain Python float
HIDDEN = 128      # lane-padded hidden width (logical width is 64)


def _round_up(v, m):
    return (v + m - 1) // m * m


# --------------------------------------------------------------------------- #
# Kernel A: GCN layer 1 (K-accumulated) + layer-2 feature transform.
#   acc   += A_hat[i,k] @ XW1[k]            (bf16 MXU, f32 accumulate)
#   k==last: Z1[i] = relu(acc + b1) @ W2    (bf16 out)
# --------------------------------------------------------------------------- #
def gcn1_kernel(bitmap_ref, adj_ref, xw1_ref, b1_ref, w2_ref, z1_ref, acc_ref,
                *, nk):
    i = pl.program_id(0)
    k = pl.program_id(1)

    @pl.when(k == 0)
    def _init():
        acc_ref[...] = jnp.zeros_like(acc_ref)

    @pl.when(bitmap_ref[i * nk + k] != 0)      # skip all-zero adjacency tiles
    def _accum():
        acc_ref[...] += jnp.dot(adj_ref[...], xw1_ref[...],
                                preferred_element_type=jnp.float32)

    @pl.when(k == nk - 1)
    def _finalize():
        h1 = jnp.maximum(acc_ref[...] + b1_ref[...], 0.0)      # (tm, HIDDEN) f32
        z1 = jnp.dot(h1, w2_ref[...], preferred_element_type=jnp.float32)
        z1_ref[...] = z1.astype(z1_ref.dtype)


# --------------------------------------------------------------------------- #
# Kernel B: GCN layer 2 propagation (K-accumulated) + per-row-block max-pool.
#   acc   += A_hat[i,k] @ Z1[k]
#   k==last: h2 = relu(acc + b2); per-block partial segment-max over the
#            graphs present in this block (scalar-prefetched [g_lo, g_hi]).
# --------------------------------------------------------------------------- #
def gcn2_pool_kernel(bitmap_ref, grange_ref, adj_ref, z1_ref, b2_ref, batch_ref,
                     pool_ref, acc_ref, *, nk, g_pad):
    i = pl.program_id(0)
    k = pl.program_id(1)

    @pl.when(k == 0)
    def _init():
        acc_ref[...] = jnp.zeros_like(acc_ref)

    @pl.when(bitmap_ref[i * nk + k] != 0)
    def _accum():
        acc_ref[...] += jnp.dot(adj_ref[...], z1_ref[...],
                                preferred_element_type=jnp.float32)

    @pl.when(k == nk - 1)
    def _pool():
        h2 = jnp.maximum(acc_ref[...] + b2_ref[...], 0.0)       # (tm, HIDDEN)
        batch_blk = batch_ref[...]                               # (tm, 1) int32
        row_ids = lax.broadcasted_iota(jnp.int32, (g_pad, HIDDEN), 0)

        def pool_one(g, partial):
            sel = jnp.where(batch_blk == g, h2, NEG_BIG)         # (tm, HIDDEN)
            blk_max = jnp.max(sel, axis=0, keepdims=True)        # (1, HIDDEN)
            return jnp.where(row_ids == g,
                             jnp.maximum(partial, blk_max), partial)

        g_lo = grange_ref[2 * i]
        g_hi = grange_ref[2 * i + 1]
        partial = jnp.full((g_pad, HIDDEN), NEG_BIG, jnp.float32)
        partial = lax.fori_loop(g_lo, g_hi + 1, pool_one, partial)
        pool_ref[0, :, :] = partial


# --------------------------------------------------------------------------- #
# Kernel C: reduce per-block partial maxima, mask padded graphs, classifier.
# --------------------------------------------------------------------------- #
def pool_reduce_classifier_kernel(parts_ref, wc1_ref, bc1_ref, wc2_ref, bc2_ref,
                                  wc3_ref, bc3_ref, out_ref, *, num_graphs):
    nb = parts_ref.shape[0]
    pooled = parts_ref[0]
    if nb > 1:
        pooled = lax.fori_loop(
            1, nb, lambda b, p: jnp.maximum(p, parts_ref[b]), pooled)
    # Zero padded / empty graph rows so -1e30 never enters the classifier.
    valid = lax.broadcasted_iota(jnp.int32, pooled.shape, 0) < num_graphs
    pooled = jnp.where(valid, jnp.maximum(pooled, 0.0), 0.0)

    c = jnp.maximum(
        jnp.dot(pooled, wc1_ref[...], preferred_element_type=jnp.float32)
        + bc1_ref[...], 0.0)
    # TODO(synk): Dropout(p=0.4) is eval-mode identity; intentionally omitted.
    c = jnp.maximum(
        jnp.dot(c, wc2_ref[...], preferred_element_type=jnp.float32)
        + bc2_ref[...], 0.0)
    logits = jnp.dot(c, wc3_ref[...], preferred_element_type=jnp.float32) \
        + bc3_ref[...]
    out_ref[...] = jax.nn.sigmoid(logits)        # (g_pad, HIDDEN); col 0 real


# --------------------------------------------------------------------------- #
# Host-side helpers.
# --------------------------------------------------------------------------- #
def build_norm_adj(edge_index, num_nodes):
    """Dense GCN normalization: D^-1/2 (A + I) D^-1/2, rows = targets."""
    src, dst = edge_index[0], edge_index[1]
    a = jnp.zeros((num_nodes, num_nodes), jnp.float32)
    a = a.at[dst, src].add(1.0)             # message src -> dst lands in row dst
    a = a + jnp.eye(num_nodes, dtype=jnp.float32)
    deg = jnp.sum(a, axis=1)
    dinv = jax.lax.rsqrt(jnp.maximum(deg, 1.0))
    return dinv[:, None] * a * dinv[None, :]


def _pad2(w, rows, cols):
    return jnp.zeros((rows, cols), jnp.float32).at[:w.shape[0], :w.shape[1]].set(w)


def _tpu_vmem_capacity():
    try:
        info = pltpu.get_tpu_info()
        cap = getattr(info, "vmem_capacity_bytes", None)
        if cap:
            return int(cap)
    except Exception:
        pass
    return 128 << 20


def _vmem_limit(bytes_needed, vmem_cap):
    # v7x-class (64 MiB physical): cap at 40 MiB, leave headroom for compiler
    # scratch.  v5e/v6e (128 MiB physical): allow up to 96 MiB.
    ceiling = (40 << 20) if vmem_cap <= (64 << 20) else (96 << 20)
    return int(min(max(bytes_needed + (8 << 20), 32 << 20), ceiling))


def _choose_tiling(n, block_m, block_k):
    """Return (n_pad, tm, tk). Small graphs use a single full-array block."""
    if n <= block_m:
        return n, n, n
    tm = block_m                                   # multiple of 128
    n_pad = _round_up(n, tm)
    tk = tm
    while tk * 2 <= min(block_k, n_pad) and n_pad % (tk * 2) == 0:
        tk *= 2
    return n_pad, tm, tk


def graphtar_forward(x, edge_index, batch, params, num_graphs, *,
                     block_m=None, block_k=None):
    n, fin = x.shape

    vmem_cap = _tpu_vmem_capacity()
    if block_m is None or block_k is None:
        bm_d, bk_d = (256, 1024) if vmem_cap <= (64 << 20) else (512, 2048)
        block_m = block_m or bm_d
        block_k = block_k or bk_d

    n_pad, tm, tk = _choose_tiling(n, block_m, block_k)
    nb, nk = n_pad // tm, n_pad // tk
    g_pad = _round_up(max(num_graphs, 1), 8)

    # --- dense normalized adjacency, padded, bf16 for the MXU ---------------
    adj = build_norm_adj(edge_index, n)
    adj_pad = jnp.zeros((n_pad, n_pad), jnp.float32).at[:n, :n].set(adj)
    adj_bf = adj_pad.astype(jnp.bfloat16)

    # Per-(row-block, k-block) nonzero bitmap (flattened 1D -> compact SMEM).
    bitmap = (jnp.abs(adj_pad.reshape(nb, tm, nk, tk)).max(axis=(1, 3)) > 0.0)
    bitmap = bitmap.astype(jnp.int32).reshape(nb * nk)

    # XW1 precomputed once (trivial XLA prologue), lane-dense bf16 operand.
    xw1 = _pad2(x @ params["w1"], n_pad, HIDDEN).astype(jnp.bfloat16)

    # Padded node rows get graph id -1 so they never win the segment max.
    batch_p = jnp.full((n_pad, 1), -1, jnp.int32).at[:n, 0].set(
        batch.astype(jnp.int32))

    # Per-row-block [g_lo, g_hi] graph-id range bounding the pooling loop.
    bb = batch_p[:, 0].reshape(nb, tm)
    g_lo = jnp.min(jnp.where(bb >= 0, bb, num_graphs), axis=1)
    g_hi = jnp.max(bb, axis=1)                       # -1 if block is all padding
    grange = jnp.stack([g_lo, g_hi], axis=1).astype(jnp.int32).reshape(nb * 2)

    # zero-pad hidden width 64 -> 128 lanes (padded lanes stay exactly zero).
    b1 = _pad2(params["b1"], 1, HIDDEN)
    w2 = _pad2(params["w2"], HIDDEN, HIDDEN)
    b2 = _pad2(params["b2"], 1, HIDDEN)
    wc1 = _pad2(params["wc1"], HIDDEN, HIDDEN)
    bc1 = _pad2(params["bc1"], 1, HIDDEN)
    wc2 = _pad2(params["wc2"], HIDDEN, HIDDEN)
    bc2 = _pad2(params["bc2"], 1, HIDDEN)
    wc3 = _pad2(params["wc3"], HIDDEN, HIDDEN)       # only column 0 is real
    bc3 = _pad2(params["bc3"], 1, HIDDEN)

    # --- pass 1: Z1 = relu(A_hat @ XW1 + b1) @ W2 (K-tiled, rows parallel) ---
    bytes_a = (2 * tm * tk * 2 + 2 * tk * HIDDEN * 2 + 2 * tm * HIDDEN * 2
               + tm * HIDDEN * 4 + 2 * (HIDDEN + 1) * HIDDEN * 4)
    z1 = pl.pallas_call(
        functools.partial(gcn1_kernel, nk=nk),
        out_shape=jax.ShapeDtypeStruct((n_pad, HIDDEN), jnp.bfloat16),
        grid_spec=pltpu.PrefetchScalarGridSpec(
            num_scalar_prefetch=1,
            grid=(nb, nk),
            in_specs=[
                # zero tiles redirect to (i,0): repeated zero tiles skip re-DMA
                pl.BlockSpec((tm, tk),
                             lambda i, k, bm: (i, jnp.where(bm[i * nk + k] != 0, k, 0))),
                pl.BlockSpec((tk, HIDDEN), lambda i, k, bm: (k, 0)),
                pl.BlockSpec((1, HIDDEN), lambda i, k, bm: (0, 0)),
                pl.BlockSpec((HIDDEN, HIDDEN), lambda i, k, bm: (0, 0)),
            ],
            out_specs=pl.BlockSpec((tm, HIDDEN), lambda i, k, bm: (i, 0)),
            scratch_shapes=[pltpu.VMEM((tm, HIDDEN), jnp.float32)]),
        compiler_params=pltpu.CompilerParams(
            dimension_semantics=("parallel", "arbitrary"),
            vmem_limit_bytes=_vmem_limit(bytes_a, vmem_cap)),
        cost_estimate=pl.CostEstimate(
            flops=2 * n_pad * n_pad * HIDDEN + 2 * n_pad * HIDDEN * HIDDEN,
            transcendentals=0,
            bytes_accessed=n_pad * n_pad * 2 + 2 * n_pad * HIDDEN * 2
            + (HIDDEN + 2) * HIDDEN * 4),
    )(bitmap, adj_bf, xw1, b1, w2)

    # --- pass 2: H2 = relu(A_hat @ Z1 + b2), per-row-block segment max ------
    bytes_b = (2 * tm * tk * 2 + 2 * tk * HIDDEN * 2 + 2 * tm * 4
               + tm * HIDDEN * 4 + 2 * g_pad * HIDDEN * 4 + HIDDEN * 4)
    pool_parts = pl.pallas_call(
        functools.partial(gcn2_pool_kernel, nk=nk, g_pad=g_pad),
        out_shape=jax.ShapeDtypeStruct((nb, g_pad, HIDDEN), jnp.float32),
        grid_spec=pltpu.PrefetchScalarGridSpec(
            num_scalar_prefetch=2,
            grid=(nb, nk),
            in_specs=[
                pl.BlockSpec((tm, tk),
                             lambda i, k, bm, gr: (i, jnp.where(bm[i * nk + k] != 0, k, 0))),
                pl.BlockSpec((tk, HIDDEN), lambda i, k, bm, gr: (k, 0)),
                pl.BlockSpec((1, HIDDEN), lambda i, k, bm, gr: (0, 0)),
                pl.BlockSpec((tm, 1), lambda i, k, bm, gr: (i, 0)),
            ],
            out_specs=pl.BlockSpec((1, g_pad, HIDDEN),
                                   lambda i, k, bm, gr: (i, 0, 0)),
            scratch_shapes=[pltpu.VMEM((tm, HIDDEN), jnp.float32)]),
        compiler_params=pltpu.CompilerParams(
            dimension_semantics=("parallel", "arbitrary"),
            vmem_limit_bytes=_vmem_limit(bytes_b, vmem_cap)),
        cost_estimate=pl.CostEstimate(
            flops=2 * n_pad * n_pad * HIDDEN,
            transcendentals=0,
            bytes_accessed=n_pad * n_pad * 2 + n_pad * HIDDEN * 2
            + n_pad * 4 + nb * g_pad * HIDDEN * 4),
    )(bitmap, grange, adj_bf, z1, b2, batch_p)

    # --- pass 3: reduce partial maxima + MLP classifier + sigmoid -----------
    bytes_c = nb * g_pad * HIDDEN * 4 + 3 * HIDDEN * HIDDEN * 4 \
        + 4 * g_pad * HIDDEN * 4
    out_pad = pl.pallas_call(
        functools.partial(pool_reduce_classifier_kernel, num_graphs=num_graphs),
        out_shape=jax.ShapeDtypeStruct((g_pad, HIDDEN), jnp.float32),
        grid=(1,),
        in_specs=[
            pl.BlockSpec((nb, g_pad, HIDDEN), lambda i: (0, 0, 0)),
            pl.BlockSpec((HIDDEN, HIDDEN), lambda i: (0, 0)),
            pl.BlockSpec((1, HIDDEN), lambda i: (0, 0)),
            pl.BlockSpec((HIDDEN, HIDDEN), lambda i: (0, 0)),
            pl.BlockSpec((1, HIDDEN), lambda i: (0, 0)),
            pl.BlockSpec((HIDDEN, HIDDEN), lambda i: (0, 0)),
            pl.BlockSpec((1, HIDDEN), lambda i: (0, 0)),
        ],
        out_specs=pl.BlockSpec((g_pad, HIDDEN), lambda i: (0, 0)),
        compiler_params=pltpu.CompilerParams(
            dimension_semantics=("arbitrary",),
            vmem_limit_bytes=_vmem_limit(bytes_c, vmem_cap)),
    )(pool_parts, wc1, bc1, wc2, bc2, wc3, bc3)

    return out_pad[:num_graphs, :1]


# --------------------------------------------------------------------------- #
# Pure-JAX reference (exact module semantics, f32, unpadded widths).
# --------------------------------------------------------------------------- #
def reference_forward(x, edge_index, batch, params, num_graphs):
    adj = build_norm_adj(edge_index, x.shape[0])
    h = jnp.maximum(adj @ (x @ params["w1"]) + params["b1"], 0.0)
    h = jnp.maximum(adj @ (h @ params["w2"]) + params["b2"], 0.0)
    mask = batch[None, :] == jnp.arange(num_graphs)[:, None]
    pooled = jnp.max(jnp.where(mask[:, :, None], h[None], -jnp.inf), axis=1)
    c = jnp.maximum(pooled @ params["wc1"] + params["bc1"], 0.0)
    c = jnp.maximum(c @ params["wc2"] + params["bc2"], 0.0)
    return jax.nn.sigmoid(c @ params["wc3"] + params["bc3"])


def init_params(key):
    ks = jax.random.split(key, 5)

    def lin(k, fan_in, fan_out):
        scale = 1.0 / jnp.sqrt(jnp.float32(fan_in))
        kw, kb = jax.random.split(k)
        w = jax.random.uniform(kw, (fan_in, fan_out), jnp.float32, -scale, scale)
        b = jax.random.uniform(kb, (1, fan_out), jnp.float32, -scale, scale)
        return w, b

    w1, b1 = lin(ks[0], 16, 64)     # GCNConv(16, 64)
    w2, b2 = lin(ks[1], 64, 64)     # GCNConv(64, 64)
    wc1, bc1 = lin(ks[2], 64, 64)   # Linear(64, 64)
    wc2, bc2 = lin(ks[3], 64, 64)   # Linear(64, 64)
    wc3, bc3 = lin(ks[4], 64, 1)    # Linear(64, 1)
    return dict(w1=w1, b1=b1, w2=w2, b2=b2,
                wc1=wc1, bc1=bc1, wc2=wc2, bc2=bc2, wc3=wc3, bc3=bc3)


if __name__ == "__main__":
    key = jax.random.PRNGKey(0)
    k_x, k_p = jax.random.split(key)

    # Two graphs of 8 nodes each (ring topology, undirected edges both ways).
    num_graphs = 2
    nodes_per_graph = 8
    n = num_graphs * nodes_per_graph
    in_feat = 16

    x = jax.random.normal(k_x, (n, in_feat), jnp.float32)

    src_list, dst_list = [], []
    for g in range(num_graphs):
        base = g * nodes_per_graph
        for i in range(nodes_per_graph):
            a = base + i
            b = base + (i + 1) % nodes_per_graph
            src_list += [a, b]
            dst_list += [b, a]
    edge_index = jnp.array([src_list, dst_list], dtype=jnp.int32)   # (2, 32)
    batch = jnp.repeat(jnp.arange(num_graphs, dtype=jnp.int32), nodes_per_graph)

    params = init_params(k_p)

    out = graphtar_forward(x, edge_index, batch, params, num_graphs)
    out = jax.block_until_ready(out)

    ref = reference_forward(x, edge_index, batch, params, num_graphs)
    assert out.shape == (num_graphs, 1)
    # bf16 adjacency-propagation operands => allow small numerical drift.
    assert jnp.allclose(out, ref, atol=3e-2, rtol=3e-2), (out, ref)

    print("KERNEL_OK")
</pallas_src>

<mosaic_0001>
module attributes {stable_mosaic.version = 11 : i64} {
  func.func @gcn1_kernel(%arg0: i32, %arg1: i32, %arg2: memref<1xi32, #tpu.memory_space<smem>>, %arg3: memref<16x16xbf16, #tpu.memory_space<vmem>>, %arg4: memref<16x128xbf16, #tpu.memory_space<vmem>>, %arg5: memref<1x128xf32, #tpu.memory_space<vmem>>, %arg6: memref<128x128xf32, #tpu.memory_space<vmem>>, %arg7: memref<16x128xbf16, #tpu.memory_space<vmem>>, %arg8: memref<16x128xf32, #tpu.memory_space<vmem>>) attributes {dimension_semantics = [#tpu.dimension_semantics<parallel>, #tpu.dimension_semantics<arbitrary>], iteration_bounds = array<i64: 1, 1>, scalar_prefetch = 1 : i64, scratch_operands = 1 : i64, tpu.core_type = #tpu.core_type<tc>, window_params = [{transform_indices = @transform_0, window_bounds = array<i64: 16, 16>}, {transform_indices = @transform_1, window_bounds = array<i64: 16, 128>}, {pipeline_mode = #tpu.pipeline_mode<synchronous>, transform_indices = @transform_2, window_bounds = array<i64: 1, 128>}, {pipeline_mode = #tpu.pipeline_mode<synchronous>, transform_indices = @transform_3, window_bounds = array<i64: 128, 128>}, {transform_indices = @transform_4, window_bounds = array<i64: 16, 128>}]} {
    %c0_i32 = arith.constant 0 : i32
    %0 = arith.cmpi eq, %arg1, %c0_i32 : i32
    %1 = arith.extui %0 : i1 to i32
    %c0_i32_0 = arith.constant 0 : i32
    %2 = arith.cmpi ne, %1, %c0_i32_0 : i32
    scf.if %2 {
      %cst = arith.constant 0.000000e+00 : f32
      %13 = vector.broadcast %cst : f32 to vector<16x128xf32>
      %c0 = arith.constant 0 : index
      %c0_5 = arith.constant 0 : index
      %14 = vector.load %arg8[%c0, %c0_5] : memref<16x128xf32, #tpu.memory_space<vmem>>, vector<16x128xf32>
      tpu.vector_store %arg8[%c0, %c0_5], %13 {strides = array<i32>} : memref<16x128xf32, #tpu.memory_space<vmem>>, vector<16x128xf32>,
    } else {
    }
    %c1_i32 = arith.constant 1 : i32
    %3 = arith.muli %arg0, %c1_i32 : i32
    %4 = arith.addi %3, %arg1 : i32
    %5 = arith.index_cast %4 : i32 to index
    %6 = memref.load %arg2[%5] : memref<1xi32, #tpu.memory_space<smem>>
    %c0_i32_1 = arith.constant 0 : i32
    %7 = arith.cmpi ne, %6, %c0_i32_1 : i32
    %8 = arith.extui %7 : i1 to i32
    %c0_i32_2 = arith.constant 0 : i32
    %9 = arith.cmpi ne, %8, %c0_i32_2 : i32
    scf.if %9 {
      %c0 = arith.constant 0 : index
      %c0_5 = arith.constant 0 : index
      %13 = vector.load %arg8[%c0, %c0_5] : memref<16x128xf32, #tpu.memory_space<vmem>>, vector<16x128xf32>
      %c0_6 = arith.constant 0 : index
      %c0_7 = arith.constant 0 : index
      %14 = vector.load %arg3[%c0_6, %c0_7] : memref<16x16xbf16, #tpu.memory_space<vmem>>, vector<16x16xbf16>
      %c0_8 = arith.constant 0 : index
      %c0_9 = arith.constant 0 : index
      %15 = vector.load %arg4[%c0_8, %c0_9] : memref<16x128xbf16, #tpu.memory_space<vmem>>, vector<16x128xbf16>
      %cst = arith.constant dense<0.000000e+00> : vector<16x128xf32>
      %16 = tpu.matmul %14, %15, %cst {dimension_numbers = #tpu.dot_dimension_numbers<[1], [0], [0], [1], [0, 0, 1, 1], [], []>} : vector<16x16xbf16>, vector<16x128xbf16>, vector<16x128xf32> -> vector<16x128xf32>
      %17 = arith.addf %13, %16 : vector<16x128xf32>
      %c0_10 = arith.constant 0 : index
      %c0_11 = arith.constant 0 : index
      %18 = vector.load %arg8[%c0_10, %c0_11] : memref<16x128xf32, #tpu.memory_space<vmem>>, vector<16x128xf32>
      tpu.vector_store %arg8[%c0_10, %c0_11], %17 {strides = array<i32>} : memref<16x128xf32, #tpu.memory_space<vmem>>, vector<16x128xf32>,
    } else {
    }
    %c0_i32_3 = arith.constant 0 : i32
    %10 = arith.cmpi eq, %arg1, %c0_i32_3 : i32
    %11 = arith.extui %10 : i1 to i32
    %c0_i32_4 = arith.constant 0 : i32
    %12 = arith.cmpi ne, %11, %c0_i32_4 : i32
    scf.if %12 {
      %c0 = arith.constant 0 : index
      %c0_5 = arith.constant 0 : index
      %13 = vector.load %arg8[%c0, %c0_5] : memref<16x128xf32, #tpu.memory_space<vmem>>, vector<16x128xf32>
      %c0_6 = arith.constant 0 : index
      %c0_7 = arith.constant 0 : index
      %14 = vector.load %arg5[%c0_6, %c0_7] : memref<1x128xf32, #tpu.memory_space<vmem>>, vector<1x128xf32>
      %15 = vector.broadcast %14 : vector<1x128xf32> to vector<16x128xf32>
      %16 = arith.addf %13, %15 : vector<16x128xf32>
      %cst = arith.constant 0.000000e+00 : f32
      %17 = vector.broadcast %cst : f32 to vector<16x128xf32>
      %18 = arith.maximumf %16, %17 : vector<16x128xf32>
      %c0_8 = arith.constant 0 : index
      %c0_9 = arith.constant 0 : index
      %19 = vector.load %arg6[%c0_8, %c0_9] : memref<128x128xf32, #tpu.memory_space<vmem>>, vector<128x128xf32>
      %cst_10 = arith.constant dense<0.000000e+00> : vector<16x128xf32>
      %20 = tpu.matmul %18, %19, %cst_10 {dimension_numbers = #tpu.dot_dimension_numbers<[1], [0], [0], [1], [0, 0, 1, 1], [], []>} : vector<16x128xf32>, vector<128x128xf32>, vector<16x128xf32> -> vector<16x128xf32>
      %21 = arith.truncf %20 : vector<16x128xf32> to vector<16x128xbf16>
      %c0_11 = arith.constant 0 : index
      %c0_12 = arith.constant 0 : index
      %22 = vector.load %arg7[%c0_11, %c0_12] : memref<16x128xbf16, #tpu.memory_space<vmem>>, vector<16x128xbf16>
      tpu.vector_store %arg7[%c0_11, %c0_12], %21 {strides = array<i32>} : memref<16x128xbf16, #tpu.memory_space<vmem>>, vector<16x128xbf16>,
    } else {
    }
    return
  }
  func.func @transform_0(%arg0: i32, %arg1: i32, %arg2: memref<1xi32, #tpu.memory_space<smem>>) -> (i32, i32) {
    %c1_i32 = arith.constant 1 : i32
    %0 = arith.muli %arg0, %c1_i32 : i32
    %1 = arith.addi %0, %arg1 : i32
    %2 = arith.index_cast %1 : i32 to index
    %3 = memref.load %arg2[%2] : memref<1xi32, #tpu.memory_space<smem>>
    %c0_i32 = arith.constant 0 : i32
    %4 = arith.cmpi ne, %3, %c0_i32 : i32
    %c0_i32_0 = arith.constant 0 : i32
    %5 = arith.select %4, %arg1, %c0_i32_0 : i32
    %c0_i32_1 = arith.constant 0 : i32
    return %arg0, %5 : i32, i32
  }
  func.func @transform_1(%arg0: i32, %arg1: i32, %arg2: memref<1xi32, #tpu.memory_space<smem>>) -> (i32, i32) {
    %c0_i32 = arith.constant 0 : i32
    %c0_i32_0 = arith.constant 0 : i32
    return %arg1, %c0_i32 : i32, i32
  }
  func.func @transform_2(%arg0: i32, %arg1: i32, %arg2: memref<1xi32, #tpu.memory_space<smem>>) -> (i32, i32) {
    %c0_i32 = arith.constant 0 : i32
    %c0_i32_0 = arith.constant 0 : i32
    %c0_i32_1 = arith.constant 0 : i32
    return %c0_i32, %c0_i32_0 : i32, i32
  }
  func.func @transform_3(%arg0: i32, %arg1: i32, %arg2: memref<1xi32, #tpu.memory_space<smem>>) -> (i32, i32) {
    %c0_i32 = arith.constant 0 : i32
    %c0_i32_0 = arith.constant 0 : i32
    %c0_i32_1 = arith.constant 0 : i32
    return %c0_i32, %c0_i32_0 : i32, i32
  }
  func.func @transform_4(%arg0: i32, %arg1: i32, %arg2: memref<1xi32, #tpu.memory_space<smem>>) -> (i32, i32) {
    %c0_i32 = arith.constant 0 : i32
    %c0_i32_0 = arith.constant 0 : i32
    return %arg0, %c0_i32 : i32, i32
  }
}

</mosaic_0001>

<bundles_post_ra>
// kernel: tpu_custom_call.1
= control target key start
LH: loop header
LB: loop body
LE: loop exit
PB: predicated region body
PF: predicated region fallthrough
CT: control target
= control target key end

     0   :  { %11 = vsyncpa [#allocation6], 0  ;;  %s529_s0 = inlined_call_operand.<no memory space> [shape: s32[1], index: 0, kind: input, shape index: {}]   ;;  %s530_s1 = inlined_call_operand.hbm [shape: bf16[16,16], index: 1, kind: input, shape index: {}]   ;;  %s531_s2 = inlined_call_operand.hbm [shape: bf16[16,128], index: 2, kind: input, shape index: {}]   ;;  %s532_s3 = inlined_call_operand.vmem [shape: f32[1,128], index: 3, kind: input, shape index: {}]   ;;  %s533_s4 = inlined_call_operand.hbm [shape: f32[128,128], index: 4, kind: input, shape index: {}]   ;;  %s534_s5 = inlined_call_operand.hbm [shape: bf16[16,128], index: 5, kind: output, shape index: {}]  }
   0x1   :  { %12 = vsyncpa [#allocation9], 0 }
   0x2   :  { %13 = vsyncpa [#allocation7], 0  ;;  %s461_s18 = smov [#allocation8]   ;;  %s462_s20 = smov [#allocation5]  }
   0x3   :  { %s37_s19 = sshll.u32 %s461_s18, 4  ;;  %s25_s21 = sshll.u32 %s462_s20, 4  ;;  %s38_s19 = int_to_ptr.vmem [resolvable:$true] %s37_s19  ;;  %s26_s21 = int_to_ptr.vmem [resolvable:$true] %s25_s21 }
   0x4   :  { %s383_s22 = scalar_lea.vmem %s38_s19, 128  ;;  %p388_p1 = scmp.lt.s32.totalorder %s38_s19, %s38_s19 }
   0x5   :  { %p384_p0 = scmp.ne.s32.totalorder %s38_s19, %s383_s22  ;;  %p389_p2 = scmp.lt.s32.totalorder %s383_s22, %s383_s22 }
   0x7   :  { %p390_p3 = por %p389_p2, %p388_p1 }
   0x9   :  { %p391_p4 = pnand %p390_p3, %p384_p0 }
   0xb   :  { %394 = shalt.err (!%p391_p4)
}
   0xc   :  { %s463_s23 = smov 64   ;;  %s464_s24 = smov 4  }
   0xd   :  { %43 = dma.hbm_to_vmem [thread:$0]  %s531_s2, 128, %s38_s19, [#allocation9], %s463_s23, %s463_s23, %s464_s24  }
   0xe   :  { %s403_s27 = scalar_lea.vmem %s26_s21, 128  ;;  %p408_p6 = scmp.lt.s32.totalorder %s26_s21, %s26_s21 }
   0xf   :  { %p404_p5 = scmp.ne.s32.totalorder %s26_s21, %s403_s27  ;;  %p409_p7 = scmp.lt.s32.totalorder %s403_s27, %s403_s27 }
  0x11   :  { %p410_p8 = por %p409_p7, %p408_p6 }
  0x13   :  { %p411_p9 = pnand %p410_p8, %p404_p5 }
  0x15   :  { %414 = shalt.err (!%p411_p9)
}
  0x16   :  { %31 = dma.hbm_to_vmem [thread:$0]  %s530_s1, 128, %s26_s21, [#allocation6], %s463_s23, %s463_s23, %s464_s24  }
  0x17   :  { %s465_s30 = smov [#allocation10]  }
  0x18   :  { %s51_s6 = sshll.u32 %s465_s30, 4  ;;  %s52_s6 = int_to_ptr.vmem [resolvable:$true] %s51_s6 }
  0x19   :  { %s423_s7 = scalar_lea.vmem %s52_s6, 2048  ;;  %p428_p11 = scmp.lt.s32.totalorder %s52_s6, %s52_s6 }
  0x1a   :  { %p424_p10 = scmp.ne.s32.totalorder %s52_s6, %s423_s7  ;;  %p429_p12 = scmp.lt.s32.totalorder %s423_s7, %s423_s7 }
  0x1c   :  { %p430_p13 = por %p429_p12, %p428_p11 }
  0x1e   :  { %p431_p0 = pnand %p430_p13, %p424_p10 }
  0x20   :  { %434 = shalt.err (!%p431_p0)
}
  0x21   :  { %s466_s2 = smov 128   ;;  %s467_s8 = smov 8  }
  0x22   :  { %57 = dma.hbm_to_vmem [thread:$0]  %s533_s4, 2048, %s52_s6, [#allocation9], %s466_s2, %s466_s2, %s467_s8  }
  0x23   :  { %455 = dma.done.wait [#allocation6], 128  }
  0x24   :  { %456 = vsyncadd [#allocation6], 4294967168 }
  0x25   :  { %457 = dma.done.wait [#allocation9], 2176  }
  0x26   :  { %458 = vsyncadd [#allocation9], 4294965120  ;;  %v468_v0 = vmov 0.0   ;;  %p287_p1 = scmp.eq.s32.totalorder %s529_s0, 0 }
  0x27   :  { %76 = vst [vmem:[#allocation2] sm:$0xff] %v468_v0  ;;  %77 = vst [vmem:[#allocation2 + $0x8] sm:$0xff] %v468_v0 }
  0x28   :  { %83 = sbr.rel (%p287_p1) target bundleno = 250 (0xfa), region = 37 }
  0x2d   :  { %v373_v1 = vld [vmem:[#allocation8] sm:$0xff]   ;;  %v469_v2 = vmov 0.0   ;;  %v374_v3 = vld [vmem:[#allocation5] sm:$0xff]   ;;  %vm470_vm0 = vmmov 0   ;;  %vm101_vm1 = vcmask 130048  }
  0x2e   :  { %321 = vmatprep.subr.bf16.mxu0 %v469_v2  ;;  %323 = vmatprep.mubr.msk.bf16.mxu0 %vm470_vm0, %v469_v2  ;;  %v84_v4 = vld [vmem:[#allocation2] sm:$0xff]  ;;  %v85_v8 = vld [vmem:[#allocation2 + $0x8] sm:$0xff] }
  0x2f   :  { %322 = vmatpush3.bf16.msra.mxu0 %v373_v1 }
  0x32   :  { %324 = vmatmul.mubr.msk.bf16.vlgmr.msra.gmra.mxu0 %vm101_vm1, %v374_v3 }
  0xf2   :  { %v139_v5 = vpop.f32.mrf.mxu0 }
  0xf3   :  { %v146_v6 = vadd.f32 %v139_v5, %v84_v4 }
  0xf4   :  { %v325_v7 = vpop.f32.mrf.mxu0 }
  0xf5   :  { %148 = vst [vmem:[#allocation2] sm:$0xff] %v146_v6 }
  0xf6   :  { %v142_v9 = vpop.f32.mrf.mxu0 }
  0xf7   :  { %v147_v10 = vadd.f32 %v142_v9, %v85_v8 }
  0xf8   :  { %v326_v11 = vpop.f32.mrf.mxu0 }
  0xf9   :  { %149 = vst [vmem:[#allocation2 + $0x8] sm:$0xff] %v147_v10 }
  0xfa PF:  { %v181_v12 = vld [vmem:[#allocation10 + $0x78] sm:$0xff]  ;;  %v180_v13 = vld [vmem:[#allocation10 + $0x70] sm:$0xff]  ;;  %v179_v14 = vld [vmem:[#allocation10 + $0x68] sm:$0xff] }
  0xfb   :  { %327 = vmatprep.subr.mxu0 %v181_v12  ;;  %v178_v15 = vld [vmem:[#allocation10 + $0x60] sm:$0xff]  ;;  %v177_v17 = vld [vmem:[#allocation10 + $0x58] sm:$0xff]  ;;  %v176_v20 = vld [vmem:[#allocation10 + $0x50] sm:$0xff] }
  0xfc   :  { %328 = vmatpush3.msra.mxu0 %v181_v12  ;;  %v153_v16 = vld [vmem:[#allocation2] sm:$0xff]  ;;  %v175_v22 = vld [vmem:[#allocation10 + $0x48] sm:$0xff]  ;;  %v173_v24 = vld [vmem:[#allocation10 + $0x38] sm:$0xff] }
  0xfd   :  { %329 = vmatprep.subr.mxu0 %v180_v13  ;;  %v291_v18 = vld [vmem:[%s532_s3] ss:$0 sm:$0xff]  ;;  %v172_v25 = vld [vmem:[#allocation10 + $0x30] sm:$0xff]  ;;  %v171_v26 = vld [vmem:[#allocation10 + $0x28] sm:$0xff]  ;;  %s471_s3 = smov [#allocation11]  }
  0xfe   :  { %330 = vmatpush3.msra.mxu0 %v180_v13  ;;  %v162_v19 = vadd.f32 %v291_v18, %v153_v16  ;;  %v174_v23 = vld [vmem:[#allocation10 + $0x40] sm:$0xff]  ;;  %v169_v28 = vld [vmem:[#allocation10 + $0x18] sm:$0xff]  ;;  %v168_v30 = vld [vmem:[#allocation10 + $0x10] sm:$0xff]  ;;  %s272_s12 = sshll.u32 %s471_s3, 4  ;;  %s273_s12 = int_to_ptr.vmem [resolvable:$true] %s272_s12 }
  0xff   :  { %331 = vmatprep.subr.mxu0 %v179_v14  ;;  %v170_v27 = vld [vmem:[#allocation10 + $0x20] sm:$0xff]  ;;  %v167_v32 = vld [vmem:[#allocation10 + $0x8] sm:$0xff]  ;;  %s435_s13 = scalar_lea.vmem %s273_s12, 128  ;;  %p440_p3 = scmp.lt.s32.totalorder %s273_s12, %s273_s12 }
 0x100   :  { %332 = vmatpush3.msra.mxu0 %v179_v14  ;;  %v164_v21 = vmax.f32 %v162_v19, 0.0  ;;  %v154_v29 = vld [vmem:[#allocation2 + $0x8] sm:$0xff]  ;;  %v166_v33 = vld [vmem:[#allocation10] sm:$0xff]  ;;  %p436_p2 = scmp.ne.s32.totalorder %s273_s12, %s435_s13  ;;  %p441_p4 = scmp.lt.s32.totalorder %s435_s13, %s435_s13 }
 0x101   :  { %333 = vmatprep.subr.mxu0 %v178_v15  ;;  %v163_v31 = vadd.f32 %v291_v18, %v154_v29 }
 0x102   :  { %334 = vmatpush3.msra.mxu0 %v178_v15  ;;  %359 = vmatprep.mubr.f32.mxu0 %v164_v21  ;;  %p442_p5 = por %p441_p4, %p440_p3 }
 0x103   :  { %335 = vmatprep.subr.mxu0 %v177_v17  ;;  %v165_v34 = vmax.f32 %v163_v31, 0.0 }
 0x104   :  { %336 = vmatpush3.msra.mxu0 %v177_v17  ;;  %p443_p6 = pnand %p442_p5, %p436_p2 }
 0x105   :  { %337 = vmatprep.subr.mxu0 %v176_v20 }
 0x106   :  { %338 = vmatpush3.msra.mxu0 %v176_v20 }
 0x107   :  { %339 = vmatprep.subr.mxu0 %v175_v22 }
 0x108   :  { %340 = vmatpush3.msra.mxu0 %v175_v22 }
 0x109   :  { %341 = vmatprep.subr.mxu0 %v174_v23 }
 0x10a   :  { %342 = vmatpush3.msra.mxu0 %v174_v23 }
 0x10b   :  { %343 = vmatprep.subr.mxu0 %v173_v24 }
 0x10c   :  { %344 = vmatpush3.msra.mxu0 %v173_v24 }
 0x10d   :  { %345 = vmatprep.subr.mxu0 %v172_v25 }
 0x10e   :  { %346 = vmatpush3.msra.mxu0 %v172_v25 }
 0x10f   :  { %347 = vmatprep.subr.mxu0 %v171_v26 }
 0x110   :  { %348 = vmatpush3.msra.mxu0 %v171_v26 }
 0x111   :  { %349 = vmatprep.subr.mxu0 %v170_v27 }
 0x112   :  { %350 = vmatpush3.msra.mxu0 %v170_v27 }
 0x113   :  { %351 = vmatprep.subr.mxu0 %v169_v28 }
 0x114   :  { %352 = vmatpush3.msra.mxu0 %v169_v28 }
 0x115   :  { %353 = vmatprep.subr.mxu0 %v168_v30 }
 0x116   :  { %354 = vmatpush3.msra.mxu0 %v168_v30 }
 0x117   :  { %355 = vmatprep.subr.mxu0 %v167_v32 }
 0x118   :  { %356 = vmatpush3.msra.mxu0 %v167_v32 }
 0x119   :  { %357 = vmatprep.subr.mxu0 %v166_v33 }
 0x11a   :  { %358 = vmatpush3.msra.mxu0 %v166_v33 }
 0x11b   :  { %360 = vmatmul.mubr.f32.vlgmr.msra.gmra.mxu0 %v165_v34 }
 0x1db   :  { %v361_v35 = vpop.f32.mrf.mxu0 }
 0x1dd   :  { %v248_v36 = vpop.f32.mrf.mxu0 }
 0x1de   :  { %v299_v37 = vpack.c.bf16 %v361_v35, %v248_v36 }
 0x1e0   :  { %300 = vst [vmem:[#allocation11] sm:$0xff] %v299_v37  }
 0x1e1   :  { %446 = shalt.err (!%p443_p6)
}
 0x1e2   :  { %278 = dma.vmem_to_hbm [thread:$0]  %s273_s12, 128, %s534_s5, [#allocation7], %s463_s23, %s463_s23, %s464_s24  }
 0x1e3   :  { %459 = dma.done.wait [#allocation7], 128  }
 0x1e4   :  { %460 = vsyncadd [#allocation7], 4294967168 }
 0x1e5   :  { %282 = vsyncpa [#allocation6], 1 }
 0x1e6   :  { %283 = vsyncpa [#allocation9], 1 }
 0x1e7   :  { %284 = vsyncpa [#allocation7], 1 }

</bundles_post_ra>
